<compile_context>
chip_gen: v5e
topology: v5e:2x2
jax: 0.10.0
libtpu: 0.0.40
codegen_flags: <defaults>
</compile_context>

<pallas_src>
import functools

import jax
import jax.numpy as jnp
from jax.experimental import pallas as pl
from jax.experimental.pallas import tpu as pltpu


def _round_up(n: int, m: int) -> int:
    return ((n + m - 1) // m) * m


def skip_embed_kernel(x_ref, w1_ref, b1_ref, w2_ref, b2_ref, o_ref, *,
                      use_bf16_matmul: bool):
    # x_ref : (TB, D_in_p)     w1_ref: (D_in_p, D_lat_p)   b1_ref: (1, D_lat_p)
    # w2_ref: (D_lat_p, D_out_p) b2_ref: (1, D_out_p)      o_ref : (TB, D_out_p)
    x = x_ref[...]
    w1 = w1_ref[...]
    w2 = w2_ref[...]

    if use_bf16_matmul:
        xm = x.astype(jnp.bfloat16)
        w1 = w1.astype(jnp.bfloat16)
        w2 = w2.astype(jnp.bfloat16)
    else:
        xm = x

    # Both matmuls accumulate in f32 on the MXU; tanh runs on the EUP in f32.
    h = jnp.tanh(jnp.dot(xm, w1, preferred_element_type=jnp.float32) + b1_ref[...])
    if use_bf16_matmul:
        h = h.astype(jnp.bfloat16)
    y = jnp.tanh(jnp.dot(h, w2, preferred_element_type=jnp.float32) + b2_ref[...])

    o_ref[...] = (y + x.astype(jnp.float32)).astype(o_ref.dtype)


def skip_embed_forward(x, w1, b1, w2, b2, *, batch_tile=None,
                       use_bf16_matmul=False, lane_multiple=128):
    """x: (B, D_in); w1: (D_in, D_lat); b1: (D_lat,); w2: (D_lat, D_out); b2: (D_out,).

    Weights are already in (in, out) layout, i.e. forward is x @ W + b.
    """
    B, D_in = x.shape
    D_in_w, D_lat = w1.shape
    D_lat2, D_out = w2.shape
    assert D_in_w == D_in and D_lat2 == D_lat
    assert D_out == D_in, "skip connection requires output_dim == input_dim"

    dtype = x.dtype
    itemsize = jnp.dtype(dtype).itemsize
    sublane = 16 if itemsize == 2 else 8

    # ---- lane-dense feature padding (exact: padded lanes stay identically zero) ----
    D_in_p = _round_up(D_in, lane_multiple)
    D_lat_p = _round_up(D_lat, lane_multiple)
    D_out_p = D_in_p  # skip connection => same padded width as the input

    # ---- batch tiling: many grid steps -> pipelined DMAs + v7x dual-TC sharding ----
    if batch_tile is None:
        batch_tile = min(512, _round_up(B, sublane))
    batch_tile = _round_up(int(batch_tile), sublane)
    assert batch_tile % sublane == 0, (
        f"batch_tile must be a multiple of {sublane} for dtype {dtype}")
    B_p = _round_up(B, batch_tile)
    n_tiles = B_p // batch_tile

    # ---- zero-pad operands (wrapper-side layout plumbing only) ----
    def pad2(a, shape):
        if a.shape == shape:
            return a
        return jnp.zeros(shape, a.dtype).at[: a.shape[0], : a.shape[1]].set(a)

    x_p = pad2(x, (B_p, D_in_p))
    w1_p = pad2(w1, (D_in_p, D_lat_p))
    w2_p = pad2(w2, (D_lat_p, D_out_p))
    b1_p = pad2(b1.reshape(1, D_lat).astype(jnp.float32), (1, D_lat_p))
    b2_p = pad2(b2.reshape(1, D_out).astype(jnp.float32), (1, D_out_p))

    # ---- explicit VMEM budget: 2x-buffered activation tiles + 1x-buffered weights ----
    vmem_est = (
        2 * batch_tile * (D_in_p + D_out_p) * itemsize          # x / out double buffers
        + (D_in_p * D_lat_p + D_lat_p * D_out_p) * itemsize     # resident weights (1x)
        + (D_lat_p + D_out_p) * 4                               # biases
        + 2 * batch_tile * D_lat_p * 4                          # f32 intermediates headroom
    )
    vmem_limit = int(min(64 * 1024 * 1024, max(32 * 1024 * 1024, 2 * vmem_est)))
    # TODO(synk): for very large D_in/D_lat (f32 weights >~16-24 MiB) add a K-tiling grid
    # axis over D_lat with a pl.when-initialized accumulator instead of fully-resident weights.

    kernel = functools.partial(skip_embed_kernel, use_bf16_matmul=use_bf16_matmul)
    resident = pl.Buffered(1)  # constant index_map -> no need to double-buffer weights

    out_p = pl.pallas_call(
        kernel,
        out_shape=jax.ShapeDtypeStruct((B_p, D_out_p), dtype),
        grid_spec=pltpu.PrefetchScalarGridSpec(
            num_scalar_prefetch=0,
            grid=(n_tiles,),
            in_specs=[
                pl.BlockSpec((batch_tile, D_in_p), lambda i: (i, 0)),
                pl.BlockSpec((D_in_p, D_lat_p), lambda i: (0, 0), pipeline_mode=resident),
                pl.BlockSpec((1, D_lat_p), lambda i: (0, 0), pipeline_mode=resident),
                pl.BlockSpec((D_lat_p, D_out_p), lambda i: (0, 0), pipeline_mode=resident),
                pl.BlockSpec((1, D_out_p), lambda i: (0, 0), pipeline_mode=resident),
            ],
            out_specs=pl.BlockSpec((batch_tile, D_out_p), lambda i: (i, 0)),
        ),
        compiler_params=pltpu.CompilerParams(
            dimension_semantics=("parallel",),
            vmem_limit_bytes=vmem_limit,
        ),
    )(x_p, w1_p, b1_p, w2_p, b2_p)

    # slice padded batch rows / feature lanes back off
    return out_p[:B, :D_out]


def init_params(key, input_dim, latent_dim, output_dim, dtype=jnp.float32):
    # Deterministic init mimicking nn.Linear (uniform +-1/sqrt(fan_in)).
    k1, k2, k3, k4 = jax.random.split(key, 4)
    lim1 = 1.0 / jnp.sqrt(input_dim)
    lim2 = 1.0 / jnp.sqrt(latent_dim)
    # PyTorch stores weight as (out, in); we keep the transposed (in, out) layout
    # directly since forward is x @ W + b.
    w1 = jax.random.uniform(k1, (input_dim, latent_dim), dtype, -lim1, lim1)
    b1 = jax.random.uniform(k2, (latent_dim,), dtype, -lim1, lim1)
    w2 = jax.random.uniform(k3, (latent_dim, output_dim), dtype, -lim2, lim2)
    b2 = jax.random.uniform(k4, (output_dim,), dtype, -lim2, lim2)
    return w1, b1, w2, b2


if __name__ == "__main__":
    key = jax.random.PRNGKey(0)
    kx, kp, kx2 = jax.random.split(key, 3)

    # Small demo shapes consistent with the module.
    batch = 8
    input_dim = 32
    latent_dim = 64
    output_dim = 32  # must equal input_dim for the residual add

    x = jax.random.normal(kx, (batch, input_dim), jnp.float32)
    w1, b1, w2, b2 = init_params(kp, input_dim, latent_dim, output_dim)
    ref_fn = lambda xx: jnp.tanh(jnp.tanh(xx @ w1 + b1) @ w2 + b2) + xx

    # 1) f32 path, tiny batch (single tile).
    out = jax.block_until_ready(skip_embed_forward(x, w1, b1, w2, b2))
    assert out.shape == (batch, output_dim)
    assert jnp.allclose(out, ref_fn(x), atol=1e-5, rtol=1e-5)

    # 2) f32 path, larger non-multiple batch -> exercises batch padding + multi-tile grid.
    x_big = jax.random.normal(kx2, (1000, input_dim), jnp.float32)
    out_big = jax.block_until_ready(skip_embed_forward(x_big, w1, b1, w2, b2))
    assert out_big.shape == (1000, output_dim)
    assert jnp.allclose(out_big, ref_fn(x_big), atol=1e-4, rtol=1e-4)

    # 3) bf16-MXU-input path (f32 accumulation) -> looser tolerance.
    out_bf16 = jax.block_until_ready(
        skip_embed_forward(x_big, w1, b1, w2, b2, use_bf16_matmul=True))
    assert jnp.allclose(out_bf16, ref_fn(x_big), atol=5e-2, rtol=5e-2)

    print("KERNEL_OK")
</pallas_src>

<mosaic_0001>
module attributes {stable_mosaic.version = 11 : i64} {
  func.func @skip_embed_kernel(%arg0: i32, %arg1: memref<8x128xf32, #tpu.memory_space<vmem>>, %arg2: memref<128x128xf32, #tpu.memory_space<vmem>>, %arg3: memref<1x128xf32, #tpu.memory_space<vmem>>, %arg4: memref<128x128xf32, #tpu.memory_space<vmem>>, %arg5: memref<1x128xf32, #tpu.memory_space<vmem>>, %arg6: memref<8x128xf32, #tpu.memory_space<vmem>>) attributes {dimension_semantics = [#tpu.dimension_semantics<parallel>], iteration_bounds = array<i64: 1>, scalar_prefetch = 0 : i64, scratch_operands = 0 : i64, tpu.core_type = #tpu.core_type<tc>, window_params = [{transform_indices = @transform_0, window_bounds = array<i64: 8, 128>}, {pipeline_mode = #tpu.pipeline_mode<synchronous>, transform_indices = @transform_1, window_bounds = array<i64: 128, 128>}, {pipeline_mode = #tpu.pipeline_mode<synchronous>, transform_indices = @transform_2, window_bounds = array<i64: 1, 128>}, {pipeline_mode = #tpu.pipeline_mode<synchronous>, transform_indices = @transform_3, window_bounds = array<i64: 128, 128>}, {pipeline_mode = #tpu.pipeline_mode<synchronous>, transform_indices = @transform_4, window_bounds = array<i64: 1, 128>}, {transform_indices = @transform_5, window_bounds = array<i64: 8, 128>}]} {
    %c0 = arith.constant 0 : index
    %c0_0 = arith.constant 0 : index
    %0 = vector.load %arg1[%c0, %c0_0] : memref<8x128xf32, #tpu.memory_space<vmem>>, vector<8x128xf32>
    %c0_1 = arith.constant 0 : index
    %c0_2 = arith.constant 0 : index
    %1 = vector.load %arg2[%c0_1, %c0_2] : memref<128x128xf32, #tpu.memory_space<vmem>>, vector<128x128xf32>
    %c0_3 = arith.constant 0 : index
    %c0_4 = arith.constant 0 : index
    %2 = vector.load %arg4[%c0_3, %c0_4] : memref<128x128xf32, #tpu.memory_space<vmem>>, vector<128x128xf32>
    %cst = arith.constant dense<0.000000e+00> : vector<8x128xf32>
    %3 = tpu.matmul %0, %1, %cst {dimension_numbers = #tpu.dot_dimension_numbers<[1], [0], [0], [1], [0, 0, 1, 1], [], []>} : vector<8x128xf32>, vector<128x128xf32>, vector<8x128xf32> -> vector<8x128xf32>
    %c0_5 = arith.constant 0 : index
    %c0_6 = arith.constant 0 : index
    %4 = vector.load %arg3[%c0_5, %c0_6] : memref<1x128xf32, #tpu.memory_space<vmem>>, vector<1x128xf32>
    %5 = vector.broadcast %4 : vector<1x128xf32> to vector<8x128xf32>
    %6 = arith.addf %3, %5 : vector<8x128xf32>
    %7 = math.tanh %6 : vector<8x128xf32>
    %cst_7 = arith.constant dense<0.000000e+00> : vector<8x128xf32>
    %8 = tpu.matmul %7, %2, %cst_7 {dimension_numbers = #tpu.dot_dimension_numbers<[1], [0], [0], [1], [0, 0, 1, 1], [], []>} : vector<8x128xf32>, vector<128x128xf32>, vector<8x128xf32> -> vector<8x128xf32>
    %c0_8 = arith.constant 0 : index
    %c0_9 = arith.constant 0 : index
    %9 = vector.load %arg5[%c0_8, %c0_9] : memref<1x128xf32, #tpu.memory_space<vmem>>, vector<1x128xf32>
    %10 = vector.broadcast %9 : vector<1x128xf32> to vector<8x128xf32>
    %11 = arith.addf %8, %10 : vector<8x128xf32>
    %12 = math.tanh %11 : vector<8x128xf32>
    %13 = arith.addf %12, %0 : vector<8x128xf32>
    %c0_10 = arith.constant 0 : index
    %c0_11 = arith.constant 0 : index
    %14 = vector.load %arg6[%c0_10, %c0_11] : memref<8x128xf32, #tpu.memory_space<vmem>>, vector<8x128xf32>
    tpu.vector_store %arg6[%c0_10, %c0_11], %13 {strides = array<i32>} : memref<8x128xf32, #tpu.memory_space<vmem>>, vector<8x128xf32>,
    return
  }
  func.func @transform_0(%arg0: i32) -> (i32, i32) {
    %c0_i32 = arith.constant 0 : i32
    %c0_i32_0 = arith.constant 0 : i32
    return %arg0, %c0_i32 : i32, i32
  }
  func.func @transform_1(%arg0: i32) -> (i32, i32) {
    %c0_i32 = arith.constant 0 : i32
    %c0_i32_0 = arith.constant 0 : i32
    %c0_i32_1 = arith.constant 0 : i32
    return %c0_i32, %c0_i32_0 : i32, i32
  }
  func.func @transform_2(%arg0: i32) -> (i32, i32) {
    %c0_i32 = arith.constant 0 : i32
    %c0_i32_0 = arith.constant 0 : i32
    %c0_i32_1 = arith.constant 0 : i32
    return %c0_i32, %c0_i32_0 : i32, i32
  }
  func.func @transform_3(%arg0: i32) -> (i32, i32) {
    %c0_i32 = arith.constant 0 : i32
    %c0_i32_0 = arith.constant 0 : i32
    %c0_i32_1 = arith.constant 0 : i32
    return %c0_i32, %c0_i32_0 : i32, i32
  }
  func.func @transform_4(%arg0: i32) -> (i32, i32) {
    %c0_i32 = arith.constant 0 : i32
    %c0_i32_0 = arith.constant 0 : i32
    %c0_i32_1 = arith.constant 0 : i32
    return %c0_i32, %c0_i32_0 : i32, i32
  }
  func.func @transform_5(%arg0: i32) -> (i32, i32) {
    %c0_i32 = arith.constant 0 : i32
    %c0_i32_0 = arith.constant 0 : i32
    return %arg0, %c0_i32 : i32, i32
  }
}

</mosaic_0001>

<bundles_post_ra>
// kernel: tpu_custom_call.1
= control target key start
LH: loop header
LB: loop body
LE: loop exit
PB: predicated region body
PF: predicated region fallthrough
CT: control target
= control target key end

     0   :  { %10 = vsyncpa [#allocation3], 0  ;;  %s337_s0 = inlined_call_operand.hbm [shape: f32[8,128], index: 0, kind: input, shape index: {}]   ;;  %s338_s1 = inlined_call_operand.hbm [shape: f32[128,128], index: 1, kind: input, shape index: {}]   ;;  %s339_s2 = inlined_call_operand.vmem [shape: f32[1,128], index: 2, kind: input, shape index: {}]   ;;  %s340_s3 = inlined_call_operand.hbm [shape: f32[128,128], index: 3, kind: input, shape index: {}]   ;;  %s341_s4 = inlined_call_operand.vmem [shape: f32[1,128], index: 4, kind: input, shape index: {}]   ;;  %s342_s5 = inlined_call_operand.hbm [shape: f32[8,128], index: 5, kind: output, shape index: {}]  }
   0x1   :  { %11 = vsyncpa [#allocation6], 0  ;;  %s28_s20 = sshll.u32 %s338_s1, 4  ;;  %s29_s20 = int_to_ptr.hbm [resolvable:$true] %s28_s20 }
   0x2   :  { %12 = vsyncpa [#allocation4], 0  ;;  %s283_s21 = smov [#allocation5]   ;;  %s18_s25 = sshll.u32 %s337_s0, 4  ;;  %s19_s25 = int_to_ptr.hbm [resolvable:$true] %s18_s25 }
   0x3   :  { %s30_s22 = sshll.u32 %s283_s21, 4  ;;  %s284_s26 = smov 128   ;;  %s31_s22 = int_to_ptr.vmem [resolvable:$true] %s30_s22 }
   0x4   :  { %s285_s27 = smov 8   ;;  %s286_s28 = smov [#allocation2]  }
   0x5   :  { %36 = dma.hbm_to_vmem [thread:$0]  %s29_s20, 2048, %s31_s22, [#allocation6], %s284_s26, %s284_s26, %s285_s27  }
   0x6   :  { %s20_s29 = sshll.u32 %s286_s28, 4  ;;  %s43_s7 = sshll.u32 %s340_s3, 4  ;;  %s21_s29 = int_to_ptr.vmem [resolvable:$true] %s20_s29  ;;  %s44_s7 = int_to_ptr.hbm [resolvable:$true] %s43_s7 }
   0x7   :  { %23 = dma.hbm_to_vmem [thread:$0]  %s19_s25, 128, %s21_s29, [#allocation3]  }
   0x8   :  { %s287_s1 = smov [#allocation7]  }
   0x9   :  { %s45_s8 = sshll.u32 %s287_s1, 4  ;;  %s46_s8 = int_to_ptr.vmem [resolvable:$true] %s45_s8 }
   0xa   :  { %51 = dma.hbm_to_vmem [thread:$0]  %s44_s7, 2048, %s46_s8, [#allocation6], %s284_s26, %s284_s26, %s285_s27  }
   0xb   :  { %277 = dma.done.wait [#allocation3], 128  }
   0xc   :  { %278 = vsyncadd [#allocation3], 4294967168 }
   0xd   :  { %279 = dma.done.wait [#allocation6], 4096  }
   0xe   :  { %280 = vsyncadd [#allocation6], 4294963200  ;;  %v82_v0 = vld [vmem:[#allocation5 + $0x78] sm:$0xff]  ;;  %v81_v1 = vld [vmem:[#allocation5 + $0x70] sm:$0xff]  ;;  %s288_s11 = smov [#allocation8]   ;;  %s158_s15 = sshll.u32 %s342_s5, 4  ;;  %s159_s15 = int_to_ptr.hbm [resolvable:$true] %s158_s15 }
   0xf   :  { %103 = vmatpush.msra.mxu0 %v82_v0  ;;  %v80_v2 = vld [vmem:[#allocation5 + $0x68] sm:$0xff]  ;;  %v79_v3 = vld [vmem:[#allocation5 + $0x60] sm:$0xff]  ;;  %v98_v4 = vld [vmem:[#allocation7 + $0x78] sm:$0xff]  ;;  %s156_s12 = sshll.u32 %s288_s11, 4  ;;  %s157_s12 = int_to_ptr.vmem [resolvable:$true] %s156_s12 }
  0x10   :  { %v78_v5 = vld [vmem:[#allocation5 + $0x58] sm:$0xff]  ;;  %128 = vmatpush.msra.mxu1 %v98_v4  ;;  %v97_v6 = vld [vmem:[#allocation7 + $0x70] sm:$0xff]  ;;  %v96_v7 = vld [vmem:[#allocation7 + $0x68] sm:$0xff] }
  0x11   :  { %104 = vmatpush.msra.mxu0 %v81_v1  ;;  %v77_v8 = vld [vmem:[#allocation5 + $0x50] sm:$0xff]  ;;  %v95_v9 = vld [vmem:[#allocation7 + $0x60] sm:$0xff]  ;;  %v76_v10 = vld [vmem:[#allocation5 + $0x48] sm:$0xff] }
  0x12   :  { %129 = vmatpush.msra.mxu1 %v97_v6  ;;  %v94_v11 = vld [vmem:[#allocation7 + $0x58] sm:$0xff]  ;;  %v75_v12 = vld [vmem:[#allocation5 + $0x40] sm:$0xff]  ;;  %v93_v13 = vld [vmem:[#allocation7 + $0x50] sm:$0xff] }
  0x13   :  { %105 = vmatpush.msra.mxu0 %v80_v2  ;;  %v74_v14 = vld [vmem:[#allocation5 + $0x38] sm:$0xff]  ;;  %v92_v15 = vld [vmem:[#allocation7 + $0x48] sm:$0xff]  ;;  %v73_v16 = vld [vmem:[#allocation5 + $0x30] sm:$0xff] }
  0x14   :  { %130 = vmatpush.msra.mxu1 %v96_v7  ;;  %v91_v17 = vld [vmem:[#allocation7 + $0x40] sm:$0xff]  ;;  %v72_v18 = vld [vmem:[#allocation5 + $0x28] sm:$0xff]  ;;  %v90_v19 = vld [vmem:[#allocation7 + $0x38] sm:$0xff] }
  0x15   :  { %106 = vmatpush.msra.mxu0 %v79_v3  ;;  %v71_v20 = vld [vmem:[#allocation5 + $0x20] sm:$0xff]  ;;  %v89_v21 = vld [vmem:[#allocation7 + $0x30] sm:$0xff]  ;;  %v70_v22 = vld [vmem:[#allocation5 + $0x18] sm:$0xff] }
  0x16   :  { %131 = vmatpush.msra.mxu1 %v95_v9  ;;  %v88_v23 = vld [vmem:[#allocation7 + $0x28] sm:$0xff]  ;;  %v69_v24 = vld [vmem:[#allocation5 + $0x10] sm:$0xff]  ;;  %v67_v26 = vld [vmem:[#allocation5] sm:$0xff] }
  0x17   :  { %107 = vmatpush.msra.mxu0 %v78_v5  ;;  %v68_v25 = vld [vmem:[#allocation5 + $0x8] sm:$0xff]  ;;  %v66_v27 = vld [vmem:[#allocation2] sm:$0xff]  ;;  %v87_v28 = vld [vmem:[#allocation7 + $0x20] sm:$0xff] }
  0x18   :  { %132 = vmatpush.msra.mxu1 %v94_v11  ;;  %v86_v29 = vld [vmem:[#allocation7 + $0x18] sm:$0xff]  ;;  %v85_v30 = vld [vmem:[#allocation7 + $0x10] sm:$0xff]  ;;  %v84_v31 = vld [vmem:[#allocation7 + $0x8] sm:$0xff] }
  0x19   :  { %108 = vmatpush.msra.mxu0 %v77_v8  ;;  %v83_v32 = vld [vmem:[#allocation7] sm:$0xff]  ;;  %v175_v33 = vld [vmem:[%s339_s2] ss:$0 sm:$0xff] }
  0x1a   :  { %133 = vmatpush.msra.mxu1 %v93_v13  ;;  %v176_v37 = vld [vmem:[%s341_s4] ss:$0 sm:$0xff] }
  0x1b   :  { %109 = vmatpush.msra.mxu0 %v76_v10 }
  0x1c   :  { %134 = vmatpush.msra.mxu1 %v92_v15 }
  0x1d   :  { %110 = vmatpush.msra.mxu0 %v75_v12 }
  0x1e   :  { %135 = vmatpush.msra.mxu1 %v91_v17 }
  0x1f   :  { %111 = vmatpush.msra.mxu0 %v74_v14 }
  0x20   :  { %136 = vmatpush.msra.mxu1 %v90_v19 }
  0x21   :  { %112 = vmatpush.msra.mxu0 %v73_v16 }
  0x22   :  { %137 = vmatpush.msra.mxu1 %v89_v21 }
  0x23   :  { %113 = vmatpush.msra.mxu0 %v72_v18 }
  0x24   :  { %138 = vmatpush.msra.mxu1 %v88_v23 }
  0x25   :  { %114 = vmatpush.msra.mxu0 %v71_v20 }
  0x26   :  { %139 = vmatpush.msra.mxu1 %v87_v28 }
  0x27   :  { %115 = vmatpush.msra.mxu0 %v70_v22 }
  0x28   :  { %140 = vmatpush.msra.mxu1 %v86_v29 }
  0x29   :  { %116 = vmatpush.msra.mxu0 %v69_v24 }
  0x2a   :  { %141 = vmatpush.msra.mxu1 %v85_v30 }
  0x2b   :  { %117 = vmatpush.msra.mxu0 %v68_v25 }
  0x2c   :  { %142 = vmatpush.msra.mxu1 %v84_v31 }
  0x2d   :  { %118 = vmatpush.msra.mxu0 %v67_v26 }
  0x2e   :  { %119 = vmatmul.f32.vlgmr.msra.gmra.mxu0 %v66_v27  ;;  %143 = vmatpush.msra.mxu1 %v83_v32 }
  0xab   :  { %v120_v34 = vpop.f32.mrf.mxu0 }
  0xac   :  { %v121_v35 = vadd.f32 %v175_v33, %v120_v34 }
  0xae   :  { %177 = vtanh.f32 %v121_v35 }
  0xb4   :  { %v178_v36 = vpop.eup %177 }
  0xb5   :  { %144 = vmatmul.f32.vlgmr.msra.gmra.mxu1 %v178_v36 }
 0x132   :  { %v145_v38 = vpop.f32.mrf.mxu1 }
 0x133   :  { %v146_v39 = vadd.f32 %v176_v37, %v145_v38 }
 0x135   :  { %179 = vtanh.f32 %v146_v39 }
 0x13b   :  { %v180_v40 = vpop.eup %179 }
 0x13c   :  { %v149_v41 = vadd.f32 %v180_v40, %v66_v27 }
 0x13e   :  { %150 = vst [vmem:[#allocation8] sm:$0xff] %v149_v41 }
 0x13f   :  { %161 = dma.vmem_to_hbm [thread:$0]  %s157_s12, 128, %s159_s15, [#allocation4]  }
 0x140   :  { %281 = dma.done.wait [#allocation4], 128  }
 0x141   :  { %282 = vsyncadd [#allocation4], 4294967168 }
 0x142   :  { %166 = vsyncpa [#allocation3], 1 }
 0x143   :  { %167 = vsyncpa [#allocation6], 1 }
 0x144   :  { %168 = vsyncpa [#allocation4], 1 }

</bundles_post_ra>
